<compile_context>
chip_gen: v6e
topology: v6e:2x2x1
jax: 0.10.0
libtpu: 0.0.40
codegen_flags: <defaults>
</compile_context>

<pallas_src>
import jax
import jax.numpy as jnp
from jax.experimental import pallas as pl
from jax.experimental.pallas import tpu as pltpu


def _round_up(x, m):
    return ((x + m - 1) // m) * m


def _mlp_kernel(x_ref, w1_ref, b1_ref, w2_ref, b2_ref, w3_ref, b3_ref, o_ref):
    """Fused 3-layer MLP on one lane-dense batch tile.

    x_ref:  (d+1, TB)  merged [input; t] block, batch on lanes.
    w*_ref: (out_features, in_features) resident weights.
    b*_ref: (out_features, 1) resident biases.
    o_ref:  (2, TB) lane-dense output block.
    """
    din = x_ref.shape[0]          # d + 1 (static)
    x = x_ref[...]                # (d+1, TB)

    # Layer 1: h1 = W1 @ [inp; t] + b1  -> (H, TB).
    if din >= 8:
        # Large input width: use the MXU.
        h1 = jnp.dot(w1_ref[...], x,
                     preferred_element_type=jnp.float32) + b1_ref[...]
    else:
        # Tiny contraction (d+1 small): expand column-wise on the VPU; this
        # also fuses the concat([inp, t]) — x row d is the time channel.
        h1 = b1_ref[...] + w1_ref[:, 0:1] * x[0:1, :]
        for k in range(1, din):   # static, fully unrolled at trace time
            h1 = h1 + w1_ref[:, k:k + 1] * x[k:k + 1, :]
    h1 = jnp.maximum(h1, 0.0)

    # Layers 2 and 3 on the MXU with f32 accumulation.
    # TODO(synk): on v6e/v7x a bf16 cast of h1/h2 and the weights (keeping
    # preferred_element_type=f32) would halve VMEM/vreg footprint if the
    # accuracy budget vs the f32 reference allows.
    h2 = jnp.dot(w2_ref[...], h1,
                 preferred_element_type=jnp.float32) + b2_ref[...]
    h2 = jnp.maximum(h2, 0.0)
    out = jnp.dot(w3_ref[...], h2,
                  preferred_element_type=jnp.float32) + b3_ref[...]

    o_ref[...] = out.astype(o_ref.dtype)   # (2, TB): dense 128-lane stores


def simple_nn_discretised_forward(inp, t, params, d=1, block_b=4096):
    """JAX/Pallas equivalent of SimpleNeuralNetworkDiscretised.forward.

    inp: (B, d) float32
    t:   (B, 1) float32
    params: (w1, b1, w2, b2, w3, b3) with w_i of shape (out, in), b_i (out, 1)
    returns: (B, d, 2) float32   (like the PyTorch module, valid for d == 1)
    """
    w1, b1, w2, b2, w3, b3 = params
    B = inp.shape[0]
    H = w1.shape[0]
    out_dim = w3.shape[0]       # == 2
    din = d + 1

    # Single merged, transposed input stream: (d+1, B) with batch on lanes.
    x = jnp.concatenate([inp, t], axis=-1).T

    # Batch tile: multiple of 128 (lane width), capped at block_b.
    TB = min(_round_up(block_b, 128), _round_up(B, 128))
    Bp = _round_up(B, TB)
    if Bp != B:
        # TODO(synk): for repeated calls in a hot loop, pad the batch once
        # outside this function to avoid the extra pad/slice HBM round trip.
        x = jnp.pad(x, ((0, 0), (0, Bp - B)))

    grid = (Bp // TB,)

    def batch_spec(rows):
        # Lane-dense streamed block: rows = features, TB batch cols on lanes.
        return pl.BlockSpec((rows, TB), lambda i: (0, i))

    def resident_spec(arr):
        # Constant block index -> weights/biases stay resident in VMEM.
        return pl.BlockSpec(arr.shape, lambda i: (0, 0))

    flops = 2 * Bp * (din * H + H * H + H * out_dim)
    bytes_accessed = 4 * (
        Bp * (din + out_dim)
        + sum(int(a.size) for a in (w1, b1, w2, b2, w3, b3))
    )

    out = pl.pallas_call(
        _mlp_kernel,
        out_shape=jax.ShapeDtypeStruct((out_dim, Bp), jnp.float32),
        grid=grid,
        in_specs=[
            batch_spec(din),                     # merged [inp; t] stream
            resident_spec(w1), resident_spec(b1),
            resident_spec(w2), resident_spec(b2),
            resident_spec(w3), resident_spec(b3),
        ],
        out_specs=batch_spec(out_dim),
        compiler_params=pltpu.CompilerParams(
            # Batch axis is embarrassingly parallel.
            # TODO(synk): on v7x, verify the grid actually shards across the
            # 2 TensorCores; if not, switch to pltpu.CORE_PARALLEL here.
            dimension_semantics=("parallel",),
        ),
        cost_estimate=pl.CostEstimate(
            flops=flops, transcendentals=0, bytes_accessed=bytes_accessed),
    )(x, w1, b1, w2, b2, w3, b3)

    out = out[:, :B].T          # (B, 2)
    # Glue: output.view(B, d, 2). Like the PyTorch module, this requires
    # out_features (=2) == 2*d, i.e. d == 1.
    return out.reshape(B, d, 2)


def _reference_forward(inp, t, params, d=1):
    """Plain-JAX reference with identical math (weights are (out, in))."""
    w1, b1, w2, b2, w3, b3 = params
    x = jnp.concatenate([inp, t], axis=-1)
    h = jnp.maximum(x @ w1.T + b1[:, 0], 0.0)
    h = jnp.maximum(h @ w2.T + b2[:, 0], 0.0)
    return (h @ w3.T + b3[:, 0]).reshape(inp.shape[0], d, 2)


def init_params(key, d=1, hidden_dim=32):
    """Deterministic parameter init.

    Weights: Xavier-uniform (as in the module's __init__), stored in PyTorch
    layout (out_features, in_features).
    Biases:  PyTorch Linear default uniform(-1/sqrt(fan_in), 1/sqrt(fan_in)),
    stored as (out_features, 1) columns for lane-broadcast in the kernel.
    """
    dims = [(d + 1, hidden_dim), (hidden_dim, hidden_dim), (hidden_dim, 2)]
    params = []
    for fan_in, fan_out in dims:
        key, kw, kb = jax.random.split(key, 3)
        limit = jnp.sqrt(6.0 / (fan_in + fan_out))
        w = jax.random.uniform(
            kw, (fan_out, fan_in), jnp.float32, minval=-limit, maxval=limit)
        blim = 1.0 / jnp.sqrt(float(fan_in))
        b = jax.random.uniform(
            kb, (fan_out, 1), jnp.float32, minval=-blim, maxval=blim)
        params += [w, b]
    return tuple(params)


if __name__ == "__main__":
    d = 1
    hidden_dim = 32

    key = jax.random.PRNGKey(0)
    key, k_in, k_t, k_p = jax.random.split(key, 4)
    params = init_params(k_p, d=d, hidden_dim=hidden_dim)

    # Small case (single tile, batch padded to one 128-lane tile).
    B = 8
    inp = jax.random.normal(k_in, (B, d), jnp.float32)   # "theta": (B, d)
    t = jax.random.uniform(k_t, (B, 1), jnp.float32)     # time:    (B, 1)

    out = simple_nn_discretised_forward(inp, t, params, d=d)
    out = jax.block_until_ready(out)
    assert out.shape == (B, d, 2), out.shape
    ref = _reference_forward(inp, t, params, d=d)
    assert jnp.allclose(out, ref, atol=1e-5, rtol=1e-5)

    # Larger, non-divisible batch: exercises the tiled grid + padding path.
    key, k_in2, k_t2 = jax.random.split(key, 3)
    B2 = 300
    inp2 = jax.random.normal(k_in2, (B2, d), jnp.float32)
    t2 = jax.random.uniform(k_t2, (B2, 1), jnp.float32)
    out2 = simple_nn_discretised_forward(inp2, t2, params, d=d, block_b=128)
    out2 = jax.block_until_ready(out2)
    assert out2.shape == (B2, d, 2), out2.shape
    ref2 = _reference_forward(inp2, t2, params, d=d)
    assert jnp.allclose(out2, ref2, atol=1e-5, rtol=1e-5)

    print("KERNEL_OK")
</pallas_src>

<mosaic_0001>
module attributes {stable_mosaic.version = 11 : i64} {
  func.func @_mlp_kernel(%arg0: i32, %arg1: memref<2x128xf32, #tpu.memory_space<vmem>>, %arg2: memref<32x2xf32, #tpu.memory_space<vmem>>, %arg3: memref<32x1xf32, #tpu.memory_space<vmem>>, %arg4: memref<32x32xf32, #tpu.memory_space<vmem>>, %arg5: memref<32x1xf32, #tpu.memory_space<vmem>>, %arg6: memref<2x32xf32, #tpu.memory_space<vmem>>, %arg7: memref<2x1xf32, #tpu.memory_space<vmem>>, %arg8: memref<2x128xf32, #tpu.memory_space<vmem>>) attributes {dimension_semantics = [#tpu.dimension_semantics<parallel>], iteration_bounds = array<i64: 1>, scalar_prefetch = 0 : i64, scratch_operands = 0 : i64, tpu.core_type = #tpu.core_type<tc>, window_params = [{transform_indices = @transform_0, window_bounds = array<i64: 2, 128>}, {pipeline_mode = #tpu.pipeline_mode<synchronous>, transform_indices = @transform_1, window_bounds = array<i64: 32, 2>}, {pipeline_mode = #tpu.pipeline_mode<synchronous>, transform_indices = @transform_2, window_bounds = array<i64: 32, 1>}, {pipeline_mode = #tpu.pipeline_mode<synchronous>, transform_indices = @transform_3, window_bounds = array<i64: 32, 32>}, {pipeline_mode = #tpu.pipeline_mode<synchronous>, transform_indices = @transform_4, window_bounds = array<i64: 32, 1>}, {pipeline_mode = #tpu.pipeline_mode<synchronous>, transform_indices = @transform_5, window_bounds = array<i64: 2, 32>}, {pipeline_mode = #tpu.pipeline_mode<synchronous>, transform_indices = @transform_6, window_bounds = array<i64: 2, 1>}, {transform_indices = @transform_7, window_bounds = array<i64: 2, 128>}]} {
    %c0 = arith.constant 0 : index
    %c0_0 = arith.constant 0 : index
    %0 = vector.load %arg1[%c0, %c0_0] : memref<2x128xf32, #tpu.memory_space<vmem>>, vector<2x128xf32>
    %c0_1 = arith.constant 0 : index
    %c0_2 = arith.constant 0 : index
    %1 = vector.load %arg3[%c0_1, %c0_2] : memref<32x1xf32, #tpu.memory_space<vmem>>, vector<32x1xf32>
    %c0_3 = arith.constant 0 : index
    %c0_4 = arith.constant 0 : index
    %2 = vector.load %arg2[%c0_3, %c0_4] : memref<32x2xf32, #tpu.memory_space<vmem>>, vector<32x1xf32>
    %3 = vector.extract_strided_slice %0 {offsets = [0, 0], sizes = [1, 128], strides = [1, 1]} : vector<2x128xf32> to vector<1x128xf32>
    %4 = vector.broadcast %2 : vector<32x1xf32> to vector<32x128xf32>
    %5 = vector.broadcast %3 : vector<1x128xf32> to vector<32x128xf32>
    %6 = arith.mulf %4, %5 : vector<32x128xf32>
    %7 = vector.broadcast %1 : vector<32x1xf32> to vector<32x128xf32>
    %8 = arith.addf %7, %6 : vector<32x128xf32>
    %c0_5 = arith.constant 0 : index
    %c1 = arith.constant 1 : index
    %9 = vector.load %arg2[%c0_5, %c1] : memref<32x2xf32, #tpu.memory_space<vmem>>, vector<32x1xf32>
    %10 = vector.extract_strided_slice %0 {offsets = [1, 0], sizes = [1, 128], strides = [1, 1]} : vector<2x128xf32> to vector<1x128xf32>
    %11 = vector.broadcast %9 : vector<32x1xf32> to vector<32x128xf32>
    %12 = vector.broadcast %10 : vector<1x128xf32> to vector<32x128xf32>
    %13 = arith.mulf %11, %12 : vector<32x128xf32>
    %14 = arith.addf %8, %13 : vector<32x128xf32>
    %cst = arith.constant 0.000000e+00 : f32
    %15 = vector.broadcast %cst : f32 to vector<32x128xf32>
    %16 = arith.maximumf %14, %15 : vector<32x128xf32>
    %c0_6 = arith.constant 0 : index
    %c0_7 = arith.constant 0 : index
    %17 = vector.load %arg4[%c0_6, %c0_7] : memref<32x32xf32, #tpu.memory_space<vmem>>, vector<32x32xf32>
    %cst_8 = arith.constant dense<0.000000e+00> : vector<32x128xf32>
    %18 = tpu.matmul %17, %16, %cst_8 {dimension_numbers = #tpu.dot_dimension_numbers<[1], [0], [0], [1], [0, 0, 1, 1], [], []>} : vector<32x32xf32>, vector<32x128xf32>, vector<32x128xf32> -> vector<32x128xf32>
    %c0_9 = arith.constant 0 : index
    %c0_10 = arith.constant 0 : index
    %19 = vector.load %arg5[%c0_9, %c0_10] : memref<32x1xf32, #tpu.memory_space<vmem>>, vector<32x1xf32>
    %20 = vector.broadcast %19 : vector<32x1xf32> to vector<32x128xf32>
    %21 = arith.addf %18, %20 : vector<32x128xf32>
    %cst_11 = arith.constant 0.000000e+00 : f32
    %22 = vector.broadcast %cst_11 : f32 to vector<32x128xf32>
    %23 = arith.maximumf %21, %22 : vector<32x128xf32>
    %c0_12 = arith.constant 0 : index
    %c0_13 = arith.constant 0 : index
    %24 = vector.load %arg6[%c0_12, %c0_13] : memref<2x32xf32, #tpu.memory_space<vmem>>, vector<2x32xf32>
    %cst_14 = arith.constant dense<0.000000e+00> : vector<2x128xf32>
    %25 = tpu.matmul %24, %23, %cst_14 {dimension_numbers = #tpu.dot_dimension_numbers<[1], [0], [0], [1], [0, 0, 1, 1], [], []>} : vector<2x32xf32>, vector<32x128xf32>, vector<2x128xf32> -> vector<2x128xf32>
    %c0_15 = arith.constant 0 : index
    %c0_16 = arith.constant 0 : index
    %26 = vector.load %arg7[%c0_15, %c0_16] : memref<2x1xf32, #tpu.memory_space<vmem>>, vector<2x1xf32>
    %27 = vector.broadcast %26 : vector<2x1xf32> to vector<2x128xf32>
    %28 = arith.addf %25, %27 : vector<2x128xf32>
    %c0_17 = arith.constant 0 : index
    %c0_18 = arith.constant 0 : index
    %29 = vector.load %arg8[%c0_17, %c0_18] : memref<2x128xf32, #tpu.memory_space<vmem>>, vector<2x128xf32>
    tpu.vector_store %arg8[%c0_17, %c0_18], %28 {strides = array<i32>} : memref<2x128xf32, #tpu.memory_space<vmem>>, vector<2x128xf32>,
    return
  }
  func.func @transform_0(%arg0: i32) -> (i32, i32) {
    %c0_i32 = arith.constant 0 : i32
    %c0_i32_0 = arith.constant 0 : i32
    return %c0_i32, %arg0 : i32, i32
  }
  func.func @transform_1(%arg0: i32) -> (i32, i32) {
    %c0_i32 = arith.constant 0 : i32
    %c0_i32_0 = arith.constant 0 : i32
    %c0_i32_1 = arith.constant 0 : i32
    return %c0_i32, %c0_i32_0 : i32, i32
  }
  func.func @transform_2(%arg0: i32) -> (i32, i32) {
    %c0_i32 = arith.constant 0 : i32
    %c0_i32_0 = arith.constant 0 : i32
    %c0_i32_1 = arith.constant 0 : i32
    return %c0_i32, %c0_i32_0 : i32, i32
  }
  func.func @transform_3(%arg0: i32) -> (i32, i32) {
    %c0_i32 = arith.constant 0 : i32
    %c0_i32_0 = arith.constant 0 : i32
    %c0_i32_1 = arith.constant 0 : i32
    return %c0_i32, %c0_i32_0 : i32, i32
  }
  func.func @transform_4(%arg0: i32) -> (i32, i32) {
    %c0_i32 = arith.constant 0 : i32
    %c0_i32_0 = arith.constant 0 : i32
    %c0_i32_1 = arith.constant 0 : i32
    return %c0_i32, %c0_i32_0 : i32, i32
  }
  func.func @transform_5(%arg0: i32) -> (i32, i32) {
    %c0_i32 = arith.constant 0 : i32
    %c0_i32_0 = arith.constant 0 : i32
    %c0_i32_1 = arith.constant 0 : i32
    return %c0_i32, %c0_i32_0 : i32, i32
  }
  func.func @transform_6(%arg0: i32) -> (i32, i32) {
    %c0_i32 = arith.constant 0 : i32
    %c0_i32_0 = arith.constant 0 : i32
    %c0_i32_1 = arith.constant 0 : i32
    return %c0_i32, %c0_i32_0 : i32, i32
  }
  func.func @transform_7(%arg0: i32) -> (i32, i32) {
    %c0_i32 = arith.constant 0 : i32
    %c0_i32_0 = arith.constant 0 : i32
    return %c0_i32, %arg0 : i32, i32
  }
}

</mosaic_0001>

<bundles_post_ra>
// kernel: tpu_custom_call.1
= control target key start
LH: loop header
LB: loop body
LE: loop exit
PB: predicated region body
PF: predicated region fallthrough
CT: control target
= control target key end

     0   :  { %v421_v2 = vmov 0   ;;  %s531_s0 = inlined_call_operand.vmem [shape: f32[2,128], index: 0, kind: input, shape index: {}]   ;;  %s532_s1 = inlined_call_operand.vmem [shape: f32[32,2], index: 1, kind: input, shape index: {}]   ;;  %s533_s2 = inlined_call_operand.vmem [shape: f32[32,1], index: 2, kind: input, shape index: {}]   ;;  %s534_s3 = inlined_call_operand.vmem [shape: f32[32,32], index: 3, kind: input, shape index: {}]   ;;  %s535_s4 = inlined_call_operand.vmem [shape: f32[32,1], index: 4, kind: input, shape index: {}]   ;;  %s536_s5 = inlined_call_operand.vmem [shape: f32[2,32], index: 5, kind: input, shape index: {}]   ;;  %s537_s6 = inlined_call_operand.vmem [shape: f32[2,1], index: 6, kind: input, shape index: {}]   ;;  %s538_s7 = inlined_call_operand.hbm [shape: f32[2,128], index: 7, kind: output, shape index: {}]  }
   0x1   :  { %v35_v0 = vld [vmem:[%s532_s1 + $0x18] sm:$0xff]  ;;  %394 = vset.pattern.permute.xlu1 %v421_v2  ;;  %393 = vset.pattern.permute.xlu0 %v421_v2  ;;  %v34_v3 = vld [vmem:[%s532_s1 + $0x10] sm:$0xff] }
   0x2   :  { %v31_v1 = vld [vmem:[%s533_s2 + $0x18] sm:$0xff]  ;;  %53 = vperm.xlu0 %393, %v35_v0  }
   0x3   :  { %81 = vperm.xlu1 %394, %v31_v1  }
   0x4   :  { %12 = vsyncpa [#allocation3], 0  ;;  %v422_v4 = vmov 1   ;;  %v33_v5 = vld [vmem:[%s532_s1 + $0x8] sm:$0xff]  ;;  %v30_v6 = vld [vmem:[%s533_s2 + $0x10] sm:$0xff]  ;;  %vm148_vm0 = vcmask 261120   ;;  %v56_v16 = vlaneseq }
   0x5   :  { %v32_v7 = vld [vmem:[%s532_s1] sm:$0xff]  ;;  %v29_v8 = vld [vmem:[%s533_s2 + $0x8] sm:$0xff]  ;;  %v127_v10 = vld [vmem:[%s535_s4 + $0x18] sm:$0xff]  ;;  %v423_v58 = vmov 0.0   ;;  %vm424_vm1 = vmmov 0   ;;  %s425_s10 = smov [#allocation2]  }
   0x6   :  { %48 = vperm.xlu0 %393, %v34_v3   ;;  %v28_v9 = vld [vmem:[%s533_s2] sm:$0xff]  ;;  %v125_v12 = vld [vmem:[%s535_s4 + $0x8] sm:$0xff]  ;;  %v126_v13 = vld [vmem:[%s535_s4 + $0x10] sm:$0xff]  ;;  %v57_v17 = vshrl.u32 %v56_v16, 7  ;;  %377 = vmatprep.subr.mxu1 %v423_v58  ;;  %s337_s11 = sshll.u32 %s425_s10, 4  ;;  %s338_s11 = int_to_ptr.vmem [resolvable:$true] %s337_s11 }
   0x7   :  { %395 = vset.pattern.permute.xlu1 %v422_v4  ;;  %v120_v11 = vld [vmem:[%s534_s3] sm:$0xff]  ;;  %v121_v55 = vld [vmem:[%s534_s3 + $0x8] sm:$0xff]  ;;  %v122_v56 = vld [vmem:[%s534_s3 + $0x10] sm:$0xff]  ;;  %385 = vmatprep.mubr.msk.f32.mxu1 %vm424_vm1, %v423_v58  ;;  %s399_s12 = scalar_lea.vmem %s338_s11, 32  ;;  %p404_p1 = scmp.lt.s32.totalorder %s338_s11, %s338_s11 }
   0x8   :  { %101 = vperm.xlu1 %395, %v35_v0   ;;  %371 = vmatprep.mubr.msk.f32.mxu0 %vm148_vm0, %v120_v11  ;;  %v124_v14 = vld [vmem:[%s535_s4] sm:$0xff]  ;;  %v58_v18 = vsub.s32 0, %v57_v17  ;;  %v106_v21 = vsub.s32 1, %v57_v17  ;;  %v123_v57 = vld [vmem:[%s534_s3 + $0x18] sm:$0xff]  ;;  %p400_p0 = scmp.ne.s32.totalorder %s338_s11, %s399_s12  ;;  %p405_p2 = scmp.lt.s32.totalorder %s399_s12, %s399_s12 }
   0x9   :  { %v251_v15 = vld [vmem:[%s537_s6] sm:$0x3] }
   0xa   :  { %43 = vperm.xlu0 %393, %v33_v5   ;;  %v27_v19 = vld [vmem:[%s531_s0] sm:$0x3]  ;;  %p406_p3 = por %p405_p2, %p404_p1 }
   0xb   :  { %v59_v20 = vrot.slane %v27_v19, %v58_v18  ;;  %v107_v25 = vrot.slane %v27_v19, %v106_v21  ;;  %v250_v11 = vld [vmem:[%s536_s5] sm:$0x3] }
   0xc   :  { %396 = vset.pattern.permute.xlu1 %v421_v2  ;;  %p407_p4 = pnand %p406_p3, %p400_p0 }
   0xd   :  { %76 = vperm.xlu1 %396, %v30_v6  }
   0xe   :  { %397 = vset.pattern.permute.xlu0 %v422_v4 }
   0xf   :  { %97 = vperm.xlu0 %397, %v34_v3  }
  0x11   :  { %38 = vperm.xlu1 %396, %v32_v7  }
  0x13   :  { %93 = vperm.xlu0 %397, %v33_v5  }
  0x15   :  { %71 = vperm.xlu1 %396, %v29_v8  }
  0x17   :  { %89 = vperm.xlu0 %397, %v32_v7  }
  0x19   :  { %66 = vperm.xlu1 %396, %v28_v9  }
  0x1b   :  { %398 = vset.pattern.permute.xlu0 %v421_v2 }
  0x1c   :  { %140 = vperm.xlu0 %398, %v126_v13  }
  0x1d   :  { %145 = vperm.xlu1 %396, %v127_v10  }
  0x20   :  { %254 = vperm.xlu0 %398, %v251_v15  }
  0x21   :  { %135 = vperm.xlu1 %396, %v125_v12  }
  0x25   :  { %130 = vperm.xlu1 %396, %v124_v14  }
  0x7d   :  { %v54_v22 = vpop.permute.xlu0 %53 }
  0x7e   :  { %v82_v23 = vpop.permute.xlu1 %81  ;;  %v63_v24 = vmul.f32 %v59_v20, %v54_v22 }
  0x80   :  { %v87_v28 = vadd.f32 %v82_v23, %v63_v24 }
  0x81   :  { %v49_v26 = vpop.permute.xlu0 %48 }
  0x82   :  { %v62_v34 = vmul.f32 %v59_v20, %v49_v26 }
  0x83   :  { %v102_v27 = vpop.permute.xlu1 %101 }
  0x84   :  { %v111_v29 = vmul.f32 %v107_v25, %v102_v27 }
  0x85   :  { %v44_v30 = vpop.permute.xlu0 %43 }
  0x86   :  { %v115_v31 = vadd.f32 %v111_v29, %v87_v28  ;;  %v61_v40 = vmul.f32 %v59_v20, %v44_v30 }
  0x88   :  { %v77_v32 = vpop.permute.xlu1 %76  ;;  %v119_v33 = vmax.f32 %v115_v31, 0.0 }
  0x89   :  { %v86_v36 = vadd.f32 %v77_v32, %v62_v34 }
  0x8a   :  { %363 = vmatprep.subr.mxu0 %v119_v33  ;;  %v98_v35 = vpop.permute.xlu0 %97 }
  0x8b   :  { %364 = vmatpush3.msra.mxu0 %v119_v33  ;;  %v110_v37 = vmul.f32 %v107_v25, %v98_v35 }
  0x8c   :  { %v39_v38 = vpop.permute.xlu1 %38 }
  0x8d   :  { %v114_v39 = vadd.f32 %v110_v37, %v86_v36  ;;  %v60_v46 = vmul.f32 %v59_v20, %v39_v38 }
  0x8e   :  { %v94_v41 = vpop.permute.xlu0 %93 }
  0x8f   :  { %v118_v42 = vmax.f32 %v114_v39, 0.0  ;;  %v109_v43 = vmul.f32 %v107_v25, %v94_v41 }
  0x90   :  { %v72_v44 = vpop.permute.xlu1 %71 }
  0x91   :  { %v85_v45 = vadd.f32 %v72_v44, %v61_v40  ;;  %365 = vmatprep.subr.mxu0 %v118_v42 }
  0x92   :  { %v90_v48 = vpop.permute.xlu0 %89  ;;  %366 = vmatpush3.msra.mxu0 %v118_v42 }
  0x93   :  { %v113_v47 = vadd.f32 %v109_v43, %v85_v45  ;;  %v108_v49 = vmul.f32 %v107_v25, %v90_v48 }
  0x94   :  { %v67_v50 = vpop.permute.xlu1 %66 }
  0x95   :  { %v117_v51 = vmax.f32 %v113_v47, 0.0  ;;  %v84_v52 = vadd.f32 %v67_v50, %v60_v46 }
  0x97   :  { %v112_v53 = vadd.f32 %v108_v49, %v84_v52  ;;  %367 = vmatprep.subr.mxu0 %v117_v51  ;;  %v141_v1 = vpop.permute.xlu0 %140 }
  0x98   :  { %368 = vmatpush3.msra.mxu0 %v117_v51  ;;  %v146_v59 = vpop.permute.xlu1 %145 }
  0x99   :  { %v116_v54 = vmax.f32 %v112_v53, 0.0 }
  0x9b   :  { %369 = vmatprep.subr.mxu0 %v116_v54  ;;  %v255_v12 = vpop.permute.xlu0 %254 }
  0x9c   :  { %370 = vmatpush3.msra.mxu0 %v116_v54  ;;  %v136_v61 = vpop.permute.xlu1 %135 }
  0x9d   :  { %372 = vmatmul.mubr.msk.f32.vlgmr.msra.gmra.mxu0 %vm148_vm0, %v121_v55 }
  0x9e   :  { %374 = vmatprep.mubr.msk.f32.mxu0 %vm148_vm0, %v122_v56 }
  0xa0   :  { %v131_v6 = vpop.permute.xlu1 %130 }
  0xa1   :  { %375 = vmatmul.mubr.msk.f32.gmra.mxu0 %vm148_vm0, %v123_v57 }
 0x15d   :  { %v373_v60 = vpop.f32.mrf.mxu0 }
 0x15e   :  { %v233_v3 = vadd.f32 %v373_v60, %v136_v61 }
 0x15f   :  { %v227_v62 = vpop.f32.mrf.mxu0 }
 0x160   :  { %v228_v7 = vadd.f32 %v227_v62, %v131_v6  ;;  %v247_v9 = vmax.f32 %v233_v3, 0.0 }
 0x161   :  { %v376_v63 = vpop.f32.mrf.mxu0 }
 0x162   :  { %v243_v0 = vadd.f32 %v376_v63, %v146_v59  ;;  %v246_v10 = vmax.f32 %v228_v7, 0.0 }
 0x163   :  { %v237_v2 = vpop.f32.mrf.mxu0 }
 0x164   :  { %v249_v4 = vmax.f32 %v243_v0, 0.0  ;;  %v238_v5 = vadd.f32 %v237_v2, %v141_v1 }
 0x166   :  { %v248_v8 = vmax.f32 %v238_v5, 0.0  ;;  %378 = vmatpush3.msra.mxu1 %v249_v4 }
 0x167   :  { %379 = vmatprep.subr.mxu1 %v423_v58 }
 0x168   :  { %380 = vmatpush3.msra.mxu1 %v248_v8 }
 0x169   :  { %381 = vmatprep.subr.mxu1 %v423_v58 }
 0x16a   :  { %382 = vmatpush3.msra.mxu1 %v247_v9 }
 0x16b   :  { %383 = vmatprep.subr.mxu1 %v423_v58 }
 0x16c   :  { %384 = vmatpush3.msra.mxu1 %v246_v10 }
 0x16d   :  { %386 = vmatmul.mubr.msk.f32.vlgmr.msra.gmra.mxu1 %vm148_vm0, %v250_v11 }
 0x22d   :  { %v326_v13 = vpop.f32.mrf.mxu1 }
 0x22e   :  { %v327_v14 = vadd.f32 %v326_v13, %v255_v12 }
 0x22f   :  { %v387_v15 = vpop.f32.mrf.mxu1 }
 0x230   :  { %330 = vst [vmem:[#allocation2] sm:$0x3] %v327_v14 }
 0x231   :  { %410 = shalt.err (!%p407_p4)
}
 0x232   :  { %340 = dma.vmem_to_hbm [thread:$0]  %s338_s11, 32, %s538_s7, [#allocation3]  }
 0x233   :  { %419 = dma.done.wait [#allocation3], 32  }
 0x234   :  { %420 = vsyncadd [#allocation3], 4294967264 }
 0x235   :  { %344 = vsyncpa [#allocation3], 1 }

</bundles_post_ra>
